<compile_context>
chip_gen: v7x
topology: tpu7x:2x2x1
jax: 0.10.0
libtpu: 0.0.40
codegen_flags: <defaults>
</compile_context>

<pallas_src>
import jax
import jax.numpy as jnp
from jax.experimental import pallas as pl
from jax.experimental.pallas import tpu as pltpu

BN_EPS = 1e-3  # matches nn.BatchNorm2d(..., eps=0.001)


def _softplus(v):
    # matches torch.nn.functional.softplus (beta=1, threshold=20)
    return jnp.where(v > 20.0, v, jnp.log(1.0 + jnp.exp(jnp.minimum(v, 20.0))))


def _sigmoid(v):
    return 1.0 / (1.0 + jnp.exp(-v))


def ffhgru_v2_forward(x, params, kernel_size=5):
    """x: (N, 3, T, H, W) float32.  Returns (out (N, 1), jv_penalty (1,))."""
    (wc, bc, w_inh, w_exc, w_iw, b_iw, w_iu, b_iu, w_ew, b_ew, w_eu, b_eu,
     alpha, mu, gamma, kappa, bn0_w, bn0_b, bn1_w, bn1_b, wt, bt) = params

    batch, c_in, t_len, hgt, wid = x.shape
    c = wc.shape[0]
    hw = hgt * wid
    m = batch * hw            # flattened (n, h, w) -> lane axis of the state
    k = kernel_size
    pad = k // 2

    # ------------------------------------------------------------------
    # Kernel 1: pointwise Conv3d(3 -> C) + softplus, streamed over
    # (sample, frame) tiles.  Output is written directly in the
    # channel-leading (T, C, N*H*W) layout used by the recurrence.
    # ------------------------------------------------------------------
    x2d = x.reshape(batch, c_in, t_len * hw)        # pure reshape, no copy

    def preproc_kernel(x_ref, wc_ref, bc_ref, o_ref):
        # x_ref: (3, HW)   wc_ref: (C, 3)   bc_ref: (C, 1)   o_ref: (C, HW)
        y = jnp.zeros((c, hw), jnp.float32)
        for ci in range(c_in):                       # K = 3: VPU FMAs, no MXU
            y = y + wc_ref[:, ci:ci + 1] * x_ref[ci:ci + 1, :]
        o_ref[...] = _softplus(y + bc_ref[...])

    xbn = pl.pallas_call(
        preproc_kernel,
        out_shape=jax.ShapeDtypeStruct((t_len, c, m), jnp.float32),
        grid_spec=pltpu.PrefetchScalarGridSpec(
            num_scalar_prefetch=0,
            grid=(batch, t_len),
            in_specs=[
                pl.BlockSpec((None, c_in, hw), lambda n, t: (n, 0, t)),
                pl.BlockSpec((c, c_in), lambda n, t: (0, 0)),
                pl.BlockSpec((c, 1), lambda n, t: (0, 0)),
            ],
            out_specs=pl.BlockSpec((None, c, hw), lambda n, t: (t, 0, n)),
        ),
        compiler_params=pltpu.CompilerParams(
            dimension_semantics=("parallel", "parallel")),
    )(x2d, wc, bc.reshape(c, 1))

    # ------------------------------------------------------------------
    # Parameter / mask repacking: tiny layout glue only (no bulk compute).
    # ------------------------------------------------------------------
    # Spatial conv weights reshaped so one MXU dot per conv handles all taps:
    #   W_stacked[o, (dy*k+dx)*C + i] = w[o, i, dy, dx]
    w_inh_s = jnp.transpose(w_inh, (0, 2, 3, 1)).reshape(c, k * k * c)
    w_exc_s = jnp.transpose(w_exc, (0, 2, 3, 1)).reshape(c, k * k * c)

    # Both 1x1 gate convs fused into one block matmul over [x_t; inh; exc]:
    #   rows 0..C  : inh_gate = Wiw x + Wiu inh           (+ b_iw + b_iu)
    #   rows C..2C : exc_gate =          Wew inh + Weu exc (+ b_ew + b_eu)
    zero_cc = jnp.zeros((c, c), jnp.float32)
    w_gate = jnp.concatenate(
        [jnp.concatenate([w_iw, w_iu, zero_cc], axis=1),
         jnp.concatenate([zero_cc, w_ew, w_eu], axis=1)], axis=0)   # (2C, 3C)
    b_gate = jnp.concatenate([b_iw + b_iu, b_ew + b_eu]).reshape(2 * c, 1)

    chan_p = jnp.stack([alpha, mu, gamma, kappa,
                        bn0_w, bn0_b, bn1_w, bn1_b], axis=1)        # (C, 8)

    # Per-tap destination-validity masks (border handling of the 'same'
    # conv on the flattened (N*H*W) lane axis), precomputed once.
    lane = jnp.arange(m, dtype=jnp.int32)
    hh = (lane // wid) % hgt
    ww = lane % wid
    mask_rows = []
    for dy in range(k):
        for dx in range(k):
            dyo, dxo = dy - pad, dx - pad
            ok = ((hh >= max(0, -dyo)) & (hh < min(hgt, hgt - dyo))
                  & (ww >= max(0, -dxo)) & (ww < min(wid, wid - dxo)))
            mask_rows.append(ok)
    tap_mask = jnp.stack(mask_rows, axis=0).astype(jnp.float32)     # (k*k, M)

    xr = x[:, 1:, 0].reshape(batch, c_in - 1, hw)                   # (N, 2, HW)
    wt_e = wt[:c].reshape(c, 1)
    wt_x = wt[c:].reshape(c_in - 1, 1)
    bt_k = jnp.reshape(bt, (1, 1)).astype(jnp.float32)

    # ------------------------------------------------------------------
    # Kernel 2: hConvGRU recurrence, one grid step per frame ("arbitrary" =
    # sequential carry through VMEM scratch), plus the 1x1 target conv +
    # global average pool readout on the last step.
    #
    # State layout is (C, N*H*W): lane-dense, channel matmuls stay 2-D,
    # BN stats are one lane reduction, and each KxK spatial conv is a single
    # (C, k*k*C) x (k*k*C, M) MXU dot over the stacked shifted taps.
    # ------------------------------------------------------------------
    def hgru_kernel(xbn_ref, xr_ref, mask_ref, winh_ref, wexc_ref,
                    wg_ref, bg_ref, chan_ref, wte_ref, wtx_ref, bt_ref,
                    o_ref, inh_ref, exc_ref):
        t = pl.program_id(0)

        @pl.when(t == 0)
        def _init():
            inh_ref[...] = jnp.zeros((c, m), jnp.float32)
            exc_ref[...] = jnp.zeros((c, m), jnp.float32)

        x_t = xbn_ref[...]                 # (C, M)
        inh = inh_ref[...]                 # pre-update inhibition
        exc = exc_ref[...]                 # pre-update excitation
        masks = mask_ref[...]              # (k*k, M)

        ch = chan_ref[...]                 # (C, 8) per-channel parameters
        alpha_c, mu_c = ch[:, 0:1], ch[:, 1:2]
        gamma_c, kappa_c = ch[:, 2:3], ch[:, 3:4]
        bn0w, bn0b = ch[:, 4:5], ch[:, 5:6]
        bn1w, bn1b = ch[:, 6:7], ch[:, 7:8]

        def conv_same(src, w_ref):
            # 'same' KxK conv over each sample's (H, W) plane on the flattened
            # (C, N*H*W) layout: build all k*k shifted + masked taps, stack
            # them along sublanes, and run ONE channel matmul.
            taps = []
            for dy in range(k):
                for dx in range(k):
                    p = dy * k + dx
                    s = (dy - pad) * wid + (dx - pad)
                    if s > 0:
                        shifted = jnp.concatenate(
                            [src[:, s:], jnp.zeros((c, s), src.dtype)], axis=1)
                    elif s < 0:
                        shifted = jnp.concatenate(
                            [jnp.zeros((c, -s), src.dtype), src[:, :s]], axis=1)
                    else:
                        shifted = src
                    taps.append(shifted * masks[p:p + 1, :])
            stacked = jnp.concatenate(taps, axis=0)          # (k*k*C, M)
            return jnp.dot(w_ref[...], stacked,
                           preferred_element_type=jnp.float32)

        def batchnorm(v, g, b):
            # BatchNorm2d(track_running_stats=False): batch stats over
            # (N, H, W) per channel, biased variance, one pass.
            mean = jnp.mean(v, axis=1, keepdims=True)
            var = jnp.maximum(
                jnp.mean(v * v, axis=1, keepdims=True) - mean * mean, 0.0)
            return (v - mean) * jax.lax.rsqrt(var + BN_EPS) * g + b

        # ---- fused 1x1 gate convs: one matmul for both gates (pre-update
        #      states, matching the PyTorch non-attention branch) ----
        sio = jnp.concatenate([x_t, inh, exc], axis=0)        # (3C, M)
        gates = _sigmoid(
            jnp.dot(wg_ref[...], sio, preferred_element_type=jnp.float32)
            + bg_ref[...])                                    # (2C, M)
        inh_gate = gates[:c]
        exc_gate = gates[c:]

        # ---- inhibition update ----
        inh_intx = batchnorm(conv_same(exc, winh_ref), bn0w, bn0b)
        inh_hat = _softplus(x_t - _softplus(inh_intx * (alpha_c * inh + mu_c)))
        inh_new = (1.0 - inh_gate) * inh + inh_gate * inh_hat

        # ---- excitation update (gate used pre-update states; conv uses new inh) ----
        exc_intx = batchnorm(conv_same(inh_new, wexc_ref), bn1w, bn1b)
        exc_hat = _softplus(exc_intx * (kappa_c * inh_new + gamma_c))
        exc_new = (1.0 - exc_gate) * exc + exc_gate * exc_hat

        inh_ref[...] = inh_new
        exc_ref[...] = exc_new

        # ---- readout on the final frame: 1x1 conv over [excitation, x[:,1:,0]]
        #      then global average pool (pool and 1x1 conv commute).
        @pl.when(t == pl.num_programs(0) - 1)
        def _readout():
            vals = []
            for n in range(batch):                              # static loop
                e_pool = jnp.mean(exc_new[:, n * hw:(n + 1) * hw], axis=1,
                                  keepdims=True)                # (C, 1)
                x_pool = jnp.mean(xr_ref[n], axis=1, keepdims=True)  # (2, 1)
                v = (jnp.sum(wte_ref[...] * e_pool, keepdims=True)
                     + jnp.sum(wtx_ref[...] * x_pool, keepdims=True)
                     + bt_ref[...])                             # (1, 1)
                vals.append(v)
            o_ref[...] = jnp.concatenate(vals, axis=1)          # (1, N)

    out_1n = pl.pallas_call(
        hgru_kernel,
        out_shape=jax.ShapeDtypeStruct((1, batch), jnp.float32),
        grid_spec=pltpu.PrefetchScalarGridSpec(
            num_scalar_prefetch=0,
            grid=(t_len,),
            in_specs=[
                pl.BlockSpec((None, c, m), lambda t: (t, 0, 0)),
                pl.BlockSpec((batch, c_in - 1, hw), lambda t: (0, 0, 0)),
                pl.BlockSpec((k * k, m), lambda t: (0, 0)),
                pl.BlockSpec((c, k * k * c), lambda t: (0, 0)),
                pl.BlockSpec((c, k * k * c), lambda t: (0, 0)),
                pl.BlockSpec((2 * c, 3 * c), lambda t: (0, 0)),
                pl.BlockSpec((2 * c, 1), lambda t: (0, 0)),
                pl.BlockSpec((c, 8), lambda t: (0, 0)),
                pl.BlockSpec((c, 1), lambda t: (0, 0)),
                pl.BlockSpec((c_in - 1, 1), lambda t: (0, 0)),
                pl.BlockSpec((1, 1), lambda t: (0, 0)),
            ],
            out_specs=pl.BlockSpec((1, batch), lambda t: (0, 0)),
            scratch_shapes=[pltpu.VMEM((c, m), jnp.float32),
                            pltpu.VMEM((c, m), jnp.float32)],
        ),
        compiler_params=pltpu.CompilerParams(
            dimension_semantics=("arbitrary",)),
    )(xbn, xr, tap_mask, w_inh_s, w_exc_s, w_gate, b_gate, chan_p,
      wt_e, wt_x, bt_k)

    out = out_1n.T                          # (N, 1)
    # TODO(synk): original code places jv_penalty on CUDA; device placement is a no-op here.
    jv_penalty = jnp.array([1.0], dtype=jnp.float32)
    return out, jv_penalty


def ffhgru_v2_reference(x, params, kernel_size=5):
    """Pure-JAX reference of the PyTorch forward (testmode=False)."""
    (wc, bc, w_inh, w_exc, w_iw, b_iw, w_iu, b_iu, w_ew, b_ew, w_eu, b_eu,
     alpha, mu, gamma, kappa, bn0_w, bn0_b, bn1_w, bn1_b, wt, bt) = params
    n_b, c_in, t_len, h, w = x.shape
    c = wc.shape[0]
    pad = kernel_size // 2

    xbn = jnp.einsum('oc,ncthw->nothw', wc, x) + bc[None, :, None, None, None]
    xbn = _softplus(xbn)

    def conv_same(v, wk):
        return jax.lax.conv_general_dilated(
            v, wk, window_strides=(1, 1), padding=[(pad, pad), (pad, pad)],
            dimension_numbers=('NCHW', 'OIHW', 'NCHW'))

    def bnorm(v, g, b):
        mean = jnp.mean(v, axis=(0, 2, 3), keepdims=True)
        var = jnp.mean((v - mean) ** 2, axis=(0, 2, 3), keepdims=True)
        return ((v - mean) / jnp.sqrt(var + BN_EPS) * g[None, :, None, None]
                + b[None, :, None, None])

    def conv1x1(v, wk, b):
        return jnp.einsum('oc,nchw->nohw', wk, v) + b[None, :, None, None]

    def cbc(p):
        return p[None, :, None, None]

    exc = jnp.zeros((n_b, c, h, w), jnp.float32)
    inh = jnp.zeros((n_b, c, h, w), jnp.float32)
    for t in range(t_len):
        xt = xbn[:, :, t]
        inh_intx = bnorm(conv_same(exc, w_inh), bn0_w, bn0_b)
        inh_hat = _softplus(xt - _softplus(inh_intx * (cbc(alpha) * inh + cbc(mu))))
        inh_gate = _sigmoid(conv1x1(xt, w_iw, b_iw) + conv1x1(inh, w_iu, b_iu))
        inh_new = (1 - inh_gate) * inh + inh_gate * inh_hat
        exc_gate = _sigmoid(conv1x1(inh, w_ew, b_ew) + conv1x1(exc, w_eu, b_eu))
        exc_intx = bnorm(conv_same(inh_new, w_exc), bn1_w, bn1_b)
        exc_hat = _softplus(exc_intx * (cbc(kappa) * inh_new + cbc(gamma)))
        exc = (1 - exc_gate) * exc + exc_gate * exc_hat
        inh = inh_new

    cat = jnp.concatenate([exc, x[:, 1:, 0]], axis=1)            # (N, C+2, H, W)
    out = jnp.einsum('oc,nchw->nohw', wt[None, :], cat) + bt     # (N, 1, H, W)
    return jnp.mean(out, axis=(2, 3))                            # (N, 1)


if __name__ == "__main__":
    # Small shapes consistent with the module: 3 input channels, `dimensions`
    # hidden channels, a handful of frames, odd spatial kernel.
    N, C_IN, C, T, H, W = 2, 3, 8, 4, 16, 16
    K = 5

    key = jax.random.PRNGKey(0)
    ks = jax.random.split(key, 24)

    def rnd(i, shape, scale):
        return jax.random.normal(ks[i], shape, dtype=jnp.float32) * scale

    x = jax.random.normal(ks[0], (N, C_IN, T, H, W), dtype=jnp.float32)

    # Deterministic synthetic parameters (shapes from __init__; no checkpoint).
    wc = rnd(1, (C, C_IN), 0.3)                # Conv3d(3, C, 1) weight (squeezed)
    bc = rnd(2, (C,), 0.1)                     # Conv3d bias
    w_inh = rnd(3, (C, C, K, K), 0.1)
    w_exc = rnd(4, (C, C, K, K), 0.1)
    w_iw = rnd(5, (C, C), 0.2); b_iw = rnd(6, (C,), 0.2)
    w_iu = rnd(7, (C, C), 0.2); b_iu = rnd(8, (C,), 0.2)
    w_ew = rnd(9, (C, C), 0.2); b_ew = rnd(10, (C,), 0.2)
    w_eu = rnd(11, (C, C), 0.2); b_eu = rnd(12, (C,), 0.2)
    alpha = 1.0 + rnd(13, (C,), 0.1)
    mu = rnd(14, (C,), 0.1)
    gamma = rnd(15, (C,), 0.1)
    kappa = 1.0 + rnd(16, (C,), 0.1)
    bn0_w = 0.1 + rnd(17, (C,), 0.01); bn0_b = rnd(18, (C,), 0.05)
    bn1_w = 0.1 + rnd(19, (C,), 0.01); bn1_b = rnd(20, (C,), 0.05)
    wt = rnd(21, (C + C_IN - 1,), 0.2)         # target_conv weight (squeezed)
    bt = rnd(22, (), 0.1)                      # target_conv bias

    params = (wc, bc, w_inh, w_exc, w_iw, b_iw, w_iu, b_iu, w_ew, b_ew,
              w_eu, b_eu, alpha, mu, gamma, kappa, bn0_w, bn0_b, bn1_w, bn1_b,
              wt, bt)

    out, jv = ffhgru_v2_forward(x, params, kernel_size=K)
    jax.block_until_ready((out, jv))

    ref = ffhgru_v2_reference(x, params, kernel_size=K)
    assert out.shape == (N, 1), out.shape
    assert jv.shape == (1,) and float(jv[0]) == 1.0
    assert jnp.allclose(out, ref, atol=2e-3, rtol=2e-3), (out, ref)

    print("KERNEL_OK")
</pallas_src>

<mosaic_0001>
module attributes {stable_mosaic.version = 11 : i64} {
  func.func @preproc_kernel(%arg0: i32, %arg1: i32, %arg2: memref<1x3x256xf32, #tpu.memory_space<vmem>>, %arg3: memref<8x3xf32, #tpu.memory_space<vmem>>, %arg4: memref<8x1xf32, #tpu.memory_space<vmem>>, %arg5: memref<1x8x256xf32, #tpu.memory_space<vmem>>) attributes {dimension_semantics = [#tpu.dimension_semantics<parallel>, #tpu.dimension_semantics<parallel>], iteration_bounds = array<i64: 2, 4>, scalar_prefetch = 0 : i64, scratch_operands = 0 : i64, tpu.core_type = #tpu.core_type<tc>, window_params = [{transform_indices = @transform_0, window_bounds = array<i64: 1, 3, 256>}, {pipeline_mode = #tpu.pipeline_mode<synchronous>, transform_indices = @transform_1, window_bounds = array<i64: 8, 3>}, {pipeline_mode = #tpu.pipeline_mode<synchronous>, transform_indices = @transform_2, window_bounds = array<i64: 8, 1>}, {transform_indices = @transform_3, window_bounds = array<i64: 1, 8, 256>}]} {
    %cst = arith.constant 0.000000e+00 : f32
    %0 = vector.broadcast %cst : f32 to vector<8x256xf32>
    %c0 = arith.constant 0 : index
    %c0_0 = arith.constant 0 : index
    %1 = vector.load %arg3[%c0, %c0_0] : memref<8x3xf32, #tpu.memory_space<vmem>>, vector<8x1xf32>
    %c0_1 = arith.constant 0 : index
    %c0_2 = arith.constant 0 : index
    %c0_3 = arith.constant 0 : index
    %2 = vector.load %arg2[%c0_1, %c0_2, %c0_3] : memref<1x3x256xf32, #tpu.memory_space<vmem>>, vector<1x1x256xf32>
    %3 = vector.shape_cast %2 : vector<1x1x256xf32> to vector<1x256xf32>
    %4 = vector.broadcast %1 : vector<8x1xf32> to vector<8x256xf32>
    %5 = vector.broadcast %3 : vector<1x256xf32> to vector<8x256xf32>
    %6 = arith.mulf %4, %5 : vector<8x256xf32>
    %7 = arith.addf %0, %6 : vector<8x256xf32>
    %c0_4 = arith.constant 0 : index
    %c1 = arith.constant 1 : index
    %8 = vector.load %arg3[%c0_4, %c1] : memref<8x3xf32, #tpu.memory_space<vmem>>, vector<8x1xf32>
    %c0_5 = arith.constant 0 : index
    %c1_6 = arith.constant 1 : index
    %c0_7 = arith.constant 0 : index
    %9 = vector.load %arg2[%c0_5, %c1_6, %c0_7] : memref<1x3x256xf32, #tpu.memory_space<vmem>>, vector<1x1x256xf32>
    %10 = vector.shape_cast %9 : vector<1x1x256xf32> to vector<1x256xf32>
    %11 = vector.broadcast %8 : vector<8x1xf32> to vector<8x256xf32>
    %12 = vector.broadcast %10 : vector<1x256xf32> to vector<8x256xf32>
    %13 = arith.mulf %11, %12 : vector<8x256xf32>
    %14 = arith.addf %7, %13 : vector<8x256xf32>
    %c0_8 = arith.constant 0 : index
    %c2 = arith.constant 2 : index
    %15 = vector.load %arg3[%c0_8, %c2] : memref<8x3xf32, #tpu.memory_space<vmem>>, vector<8x1xf32>
    %c0_9 = arith.constant 0 : index
    %c2_10 = arith.constant 2 : index
    %c0_11 = arith.constant 0 : index
    %16 = vector.load %arg2[%c0_9, %c2_10, %c0_11] : memref<1x3x256xf32, #tpu.memory_space<vmem>>, vector<1x1x256xf32>
    %17 = vector.shape_cast %16 : vector<1x1x256xf32> to vector<1x256xf32>
    %18 = vector.broadcast %15 : vector<8x1xf32> to vector<8x256xf32>
    %19 = vector.broadcast %17 : vector<1x256xf32> to vector<8x256xf32>
    %20 = arith.mulf %18, %19 : vector<8x256xf32>
    %21 = arith.addf %14, %20 : vector<8x256xf32>
    %c0_12 = arith.constant 0 : index
    %c0_13 = arith.constant 0 : index
    %22 = vector.load %arg4[%c0_12, %c0_13] : memref<8x1xf32, #tpu.memory_space<vmem>>, vector<8x1xf32>
    %23 = vector.broadcast %22 : vector<8x1xf32> to vector<8x256xf32>
    %24 = arith.addf %21, %23 : vector<8x256xf32>
    %cst_14 = arith.constant 2.000000e+01 : f32
    %25 = vector.broadcast %cst_14 : f32 to vector<8x256xf32>
    %26 = arith.cmpf ogt, %24, %25 : vector<8x256xf32>
    %cst_15 = arith.constant 2.000000e+01 : f32
    %27 = vector.broadcast %cst_15 : f32 to vector<8x256xf32>
    %28 = arith.minimumf %24, %27 : vector<8x256xf32>
    %29 = math.exp %28 : vector<8x256xf32>
    %cst_16 = arith.constant 1.000000e+00 : f32
    %30 = vector.broadcast %cst_16 : f32 to vector<8x256xf32>
    %31 = arith.addf %30, %29 : vector<8x256xf32>
    %32 = math.log %31 : vector<8x256xf32>
    %33 = arith.select %26, %24, %32 : vector<8x256xi1>, vector<8x256xf32>
    %c0_17 = arith.constant 0 : index
    %c0_18 = arith.constant 0 : index
    %c0_19 = arith.constant 0 : index
    %34 = vector.load %arg5[%c0_17, %c0_18, %c0_19] : memref<1x8x256xf32, #tpu.memory_space<vmem>>, vector<1x8x256xf32>
    %35 = vector.shape_cast %34 : vector<1x8x256xf32> to vector<8x256xf32>
    %36 = vector.shape_cast %33 : vector<8x256xf32> to vector<1x8x256xf32>
    tpu.vector_store %arg5[%c0_17, %c0_18, %c0_19], %36 {strides = array<i32>} : memref<1x8x256xf32, #tpu.memory_space<vmem>>, vector<1x8x256xf32>,
    return
  }
  func.func @transform_0(%arg0: i32, %arg1: i32) -> (i32, i32, i32) {
    %c0_i32 = arith.constant 0 : i32
    %c0_i32_0 = arith.constant 0 : i32
    return %arg0, %c0_i32, %arg1 : i32, i32, i32
  }
  func.func @transform_1(%arg0: i32, %arg1: i32) -> (i32, i32) {
    %c0_i32 = arith.constant 0 : i32
    %c0_i32_0 = arith.constant 0 : i32
    %c0_i32_1 = arith.constant 0 : i32
    return %c0_i32, %c0_i32_0 : i32, i32
  }
  func.func @transform_2(%arg0: i32, %arg1: i32) -> (i32, i32) {
    %c0_i32 = arith.constant 0 : i32
    %c0_i32_0 = arith.constant 0 : i32
    %c0_i32_1 = arith.constant 0 : i32
    return %c0_i32, %c0_i32_0 : i32, i32
  }
  func.func @transform_3(%arg0: i32, %arg1: i32) -> (i32, i32, i32) {
    %c0_i32 = arith.constant 0 : i32
    %c0_i32_0 = arith.constant 0 : i32
    return %arg1, %c0_i32, %arg0 : i32, i32, i32
  }
}

</mosaic_0001>

<bundles_post_ra>
// kernel: tpu_custom_call.1
= control target key start
LH: loop header
LB: loop body
LE: loop exit
PB: predicated region body
PF: predicated region fallthrough
CT: control target
= control target key end

     0   :  { %8 = vsyncpa [#allocation3], 0  ;;  %s752_s0 = inlined_call_operand.vmem [shape: f32[2,3,1024], index: 0, kind: input, shape index: {}]   ;;  %s753_s1 = inlined_call_operand.vmem [shape: f32[8,3], index: 1, kind: input, shape index: {}]   ;;  %s754_s2 = inlined_call_operand.vmem [shape: f32[8,1], index: 2, kind: input, shape index: {}]   ;;  %s755_s3 = inlined_call_operand.hbm [shape: f32[4,8,512], index: 3, kind: output, shape index: {}]  }
   0x1   :  { %10 = vsyncpa [#allocation3 + $0x1], 0  ;;  %s610_s12 = smov 0   ;;  %s612_s13 = smov 0  }
   0x2   :  { %s614_s14 = smov 0   ;;  %s616_s15 = smov 0  }
   0x3   :  { %s618_s16 = smov 0   ;;  %s620_s17 = smov 0  }
   0x4   :  { %s622_s18 = smov 0   ;;  %s624_s19 = smov 0  }
   0x5 LB: > { %s386_s20 = sadd.s32 4294967295, %s584_s19   ;;  %s387_s21 = sadd.s32 4294967294, %s584_s19   ;;  %s584_s19 = sphi %s624_s19, %s16_s19   ;;  %s580_s18 = sphi %s622_s18, %s764_s18   ;;  %s576_s17 = sphi %s620_s17, %s763_s17   ;;  %s572_s16 = sphi %s618_s16, %s762_s16   ;;  %s568_s15 = sphi %s616_s15, %s761_s15   ;;  %s564_s14 = sphi %s614_s14, %s760_s14   ;;  %s560_s13 = sphi %s612_s13, %s759_s13   ;;  %s556_s12 = sphi %s610_s12, %s758_s12  }
   0x6   : > { %s25_s22 = sadd.s32 1, %s576_s17  ;;  %s28_s23 = sadd.s32 1, %s580_s18 }
   0x7   : > { %p26_p0 = scmp.ge.s32.totalorder %s25_s22, 4  ;;  %p117_p1 = scmp.ne.s32.totalorder %s564_s14, %s560_s13 }
   0x8   : > { %p118_p2 = scmp.eq.s32.totalorder %s386_s20, 7  ;;  %p123_p5 = scmp.ne.s32.totalorder %s560_s13, %s556_s12 }
   0x9   : > { %s766_s22 = smov (%p26_p0, %s25_s22), 0  ;;  %s768_s23 = smov (!%p26_p0, %s28_s23), %s580_s18 }
   0xa   : > { %s102_s24 = ssub.s32 %s576_s17, %s766_s22  ;;  %p661_p3 = por %p118_p2, %p117_p1 }
   0xb   : > { %p30_p4 = scmp.ge.s32.totalorder %s768_s23, 2  ;;  %p124_p6 = scmp.eq.s32.totalorder %s387_s21, 7 }
   0xc   : > { %p390_p7 = scmp.ge.s32.totalorder %s584_s19, 1  ;;  %p161_p9 = scmp.lt.s32.totalorder %s584_s19, 9 }
   0xd   : > { %s770_s23 = smov (%p30_p4, %s768_s23), 0  ;;  %p670_p8 = por %p124_p6, %p123_p5 }
   0xe   : > { %s103_s27 = ssub.s32 %s580_s18, %s770_s23  ;;  %s107_s28 = sadd.s32 1, %s564_s14 }
   0xf   : > { %s104_s29 = sor.u32 %s103_s27, %s102_s24  ;;  %p162_p10 = pnand %p390_p7, %p161_p9 }
  0x10   : > { %p105_p11 = scmp.eq.s32.totalorder %s104_s29, 0  ;;  %v200_v0 = vld [vmem:[%s753_s1] sm:$0xff] (!%p162_p10)  ;;  %v586_v1 = vmov (!%p162_p10), 0   ;;  %v587_v2 = vmov (!%p162_p10), 2   ;;  %v588_v4 = vmov (!%p162_p10), 1   ;;  %s392_s8 = sshll.u32 (!%p162_p10), %s568_s15, 1  ;;  %v208_v5 = vlaneseq (!%p162_p10) }
  0x11   : > { %165 = sbr.rel (%p162_p10) target bundleno = 206 (0xce), region = 32  ;;  %477 = vset.pattern.permute.xlu0 (!%p162_p10), %v586_v1  ;;  %479 = vset.pattern.permute.xlu1 (!%p162_p10), %v587_v2  ;;  %v264_v3 = vld [vmem:[%s754_s2] sm:$0xff] (!%p162_p10)  ;;  %p190_p12 = scmp.lt.s32.totalorder (!%p162_p10), %s572_s16, 1 }
  0x12   : > { %s679_s30 = scalar_select %p105_p11, %s564_s14, %s107_s28  }
  0x13   : > { %204 = vperm.xlu0 (!%p162_p10), %477, %v200_v0   ;;  %246 = vperm.xlu1 (!%p162_p10), %479, %v200_v0   ;;  %p192_p13 = scmp.lt.s32.totalorder (!%p162_p10), %s392_s8, 7  ;;  %v209_v6 = vshrl.u32 (!%p162_p10), %v208_v5, 7  ;;  %s186_s28 = sand.u32 (!%p162_p10), 1, %s560_s13  }
  0x14   : > { %s391_s29 = sshll.u32 (!%p162_p10), %s186_s28, 4  ;;  %s398_s4 = sshll.u32 (!%p162_p10), %s572_s16, 1 }
  0x15   : > { %v210_v7 = vsub.s32 (!%p162_p10), 0, %v209_v6  ;;  %v214_v8 = vsub.s32 (!%p162_p10), 1, %v209_v6  ;;  %s399_s5 = sshll.u32 (!%p162_p10), %s568_s15, 2  ;;  %s291_s15 = scalar_lea.sflag (!%p162_p10), [#allocation3], %s186_s28 }
  0x16   : > { %s303_s6 = sadd.s32 (!%p162_p10), %s399_s5, %s398_s4  ;;  %s589_s21 = smov (!%p162_p10), [#allocation2]  }
  0x17   : > { %478 = vset.pattern.permute.xlu0 (!%p162_p10), %v588_v4  ;;  %480 = vset.pattern.permute.xlu1 (!%p162_p10), %v586_v1  ;;  %s400_s7 = sshll.u32 (!%p162_p10), %s303_s6, 7  ;;  %s494_s24 = sshll.u32 (!%p162_p10), %s589_s21, 4  ;;  %s495_s24 = int_to_ptr.vmem [resolvable:$false] %s494_s24 }
  0x18   : > { %225 = vperm.xlu0 %478, %v200_v0   ;;  %267 = vperm.xlu1 %480, %v264_v3   ;;  %s191_s9 = scalar_select %p190_p12, %s572_s16, 1 }
  0x19   : > { %s772_s8 = smov (!%p192_p13, %s392_s8), 7 }
  0x1a   : > { %s393_s10 = sshll.u32 %s191_s9, 3 }
  0x1b   : > { %s195_s11 = sadd.s32 %s393_s10, %s772_s8  ;;  %s188_s8 = scalar_lea.vmem [#allocation2], %s391_s29 }
  0x1c   : > { %481 = vset.pattern.permute.xlu0 %v586_v1  ;;  %s394_s20 = sshll.u32 %s195_s11, 2  ;;  %s307_s9 = sshll.u32 %s188_s8, 4  ;;  %s701_s9 = int_to_ptr.vmem [resolvable:$true] %s307_s9 }
  0x1d   : > { %s197_s27 = scalar_lea.vmem %s752_s0, %s394_s20  ;;  %s699_s20 = scalar_lea.hbm %s755_s3, %s400_s7 }
  0x1e   : > { %v201_v9 = vld [vmem:[%s197_s27] ss:$4 sm:$0x3]  ;;  %v395_v10 = vld [vmem:[%s197_s27 + $0x1] ss:$4 sm:$0x3]  ;;  %p497_p4 = scmp.lt.s32.totalorder %s701_s9, %s495_s24 }
  0x1f   : > { %v396_v11 = vld [vmem:[%s197_s27 + $0x2] ss:$4 sm:$0x3]  ;;  %v211_v13 = vrot.slane %v201_v9, %v210_v7  ;;  %v215_v14 = vrot.slane %v201_v9, %v214_v8  ;;  %v232_v15 = vrot.slane %v395_v10, %v210_v7  ;;  %v236_v16 = vrot.slane %v395_v10, %v214_v8  ;;  %s490_s16 = scalar_lea.vmem %s701_s9, 256  ;;  %s496_s27 = scalar_lea.vmem %s495_s24, 512 }
  0x20   : > { %v253_v17 = vrot.slane %v396_v11, %v210_v7  ;;  %v257_v18 = vrot.slane %v396_v11, %v214_v8  ;;  %p491_p0 = scmp.ne.s32.totalorder %s701_s9, %s490_s16  ;;  %p498_p5 = scmp.lt.s32.totalorder %s496_s27, %s490_s16 }
  0x22   : > { %p492_p1 = pnand %p491_p0, %p661_p3  ;;  %p499_p6 = por %p498_p5, %p497_p4 }
  0x24   : > { %p493_p2 = pneg %p492_p1 }
  0x26   : > { %p500_p7 = pnand %p499_p6, %p493_p2 }
  0x92   : > { %v205_v12 = vpop.permute.xlu0 %204  ;;  %v247_v19 = vpop.permute.xlu1 %246 }
  0x93   : > { %v218_v20 = vmul.f32 %v211_v13, %v205_v12  ;;  %v219_v21 = vmul.f32 %v215_v14, %v205_v12  ;;  %v260_v25 = vmul.f32 %v253_v17, %v247_v19  ;;  %v261_v26 = vmul.f32 %v257_v18, %v247_v19 }
  0x97   : > { %v226_v22 = vpop.permute.xlu0 %225  ;;  %v268_v29 = vpop.permute.xlu1 %267 }
  0x98   : > { %v239_v23 = vmul.f32 %v232_v15, %v226_v22  ;;  %v240_v24 = vmul.f32 %v236_v16, %v226_v22 }
  0x9a   : > { %v241_v27 = vadd.f32 %v239_v23, %v218_v20  ;;  %v242_v28 = vadd.f32 %v240_v24, %v219_v21 }
  0x9c   : > { %v262_v30 = vadd.f32 %v260_v25, %v241_v27  ;;  %v263_v31 = vadd.f32 %v261_v26, %v242_v28 }
  0x9e   : > { %v270_v32 = vadd.f32 %v268_v29, %v262_v30  ;;  %v271_v33 = vadd.f32 %v268_v29, %v263_v31 }
  0xa0   : > { %v274_v34 = vmin.f32 %v270_v32, 20.0  ;;  %v275_v35 = vmin.f32 %v271_v33, 20.0  ;;  %vm272_vm0 = vcmp.gt.f32.partialorder %v270_v32, 20.0  ;;  %vm273_vm1 = vcmp.gt.f32.partialorder %v271_v33, 20.0 }
  0xa2   : > { %v276_v36 = vmul.f32 1.442695, %v274_v34  ;;  %v278_v37 = vmul.f32 1.442695, %v275_v35 }
  0xa4   : > { %482 = vpow2.f32 %v276_v36 }
  0xa5   : > { %484 = vpow2.f32 %v278_v37 }
  0xae   : > { %v483_v38 = vpop.eup %482 }
  0xaf   : > { %v485_v39 = vpop.eup %484  ;;  %v280_v40 = vadd.f32 1.0, %v483_v38 }
  0xb0   : > { %v281_v41 = vadd.f32 1.0, %v485_v39 }
  0xb1   : > { %486 = vlog2.f32 %v280_v40 }
  0xb2   : > { %488 = vlog2.f32 %v281_v41 }
  0xbb   : > { %v487_v42 = vpop.eup %486 }
  0xbc   : > { %v489_v43 = vpop.eup %488  ;;  %v283_v44 = vmul.f32 0.6931472, %v487_v42 }
  0xbd   : > { %v285_v45 = vmul.f32 0.6931472, %v489_v43 }
  0xbe   : > { %v286_v46 = vsel %vm272_vm0, %v270_v32, %v283_v44 }
  0xbf   : > { %v287_v47 = vsel %vm273_vm1, %v271_v33, %v285_v45  ;;  %288 = vst [vmem:[%s188_s8] sm:$0xff] %v286_v46 }
  0xc0   : > { %289 = vst [vmem:[%s188_s8 + $0x8] sm:$0xff] %v287_v47 }
  0xc1   : > { %503 = shalt.err (!%p500_p7)
}
  0xc2   : > { %s504_s28 = scalar_lea.hbm %s699_s20, 256  ;;  %s508_s5 = scalar_lea.hbm %s755_s3, 2048 }
  0xc3   : > { %p505_p9 = scmp.ne.s32.totalorder %s699_s20, %s504_s28  ;;  %p509_p12 = scmp.lt.u32.totalorder %s699_s20, %s755_s3 }
  0xc4   : > { %p510_p13 = scmp.lt.u32.totalorder %s508_s5, %s504_s28  ;;  %p512_p1 = scmp.lt.u32.totalorder %s504_s28, %s699_s20 }
  0xc5   : > { %p506_p10 = pnand %p505_p9, %p661_p3 }
  0xc6   : > { %p511_p0 = por %p510_p13, %p509_p12 }
  0xc7   : > { %p507_p11 = pneg %p506_p10 }
  0xc8   : > { %p513_p2 = por %p512_p1, %p511_p0 }
  0xca   : > { %p514_p4 = pnand %p513_p2, %p507_p11 }
  0xcc   : > { %517 = shalt.err (!%p514_p4)
}
  0xcd   : > { %403 = dma.vmem_to_hbm [thread:$0]  (%p661_p3), %s701_s9, 256, %s699_s20, %s291_s15  }
  0xce PF: > { %p409_p5 = scmp.ge.s32.totalorder %s584_s19, 2  ;;  %s319_s8 = sand.u32 1, %s556_s12  }
  0xcf   : > { %s320_s10 = scalar_lea.sflag [#allocation3], %s319_s8 }
  0xd0   : > { %p406_p6 = pnand %p409_p5, %p670_p8 }
  0xd2   : > { %551 = dma.done.wait (!%p406_p6), %s320_s10, 256  }
  0xd3   : > { %553 = vsyncadd (!%p406_p6), %s320_s10, 4294967040  ;;  %s16_s19 = sadd.s32 1, %s584_s19   ;;  %s758_s12 = smov %s560_s13 }
  0xd4   : > { %p13_p7 = scmp.ge.s32.totalorder %s16_s19, 10   ;;  %s759_s13 = smov %s564_s14 }
  0xd5   : > { %s760_s14 = smov %s679_s30  ;;  %s761_s15 = smov %s576_s17 }
  0xd6   : > { %s762_s16 = smov %s580_s18  ;;  %s763_s17 = smov %s766_s22 }
  0xd7   : > { %s764_s18 = smov %s770_s23  ;;  %15 = sbr.rel (!%p13_p7) target bundleno = 5 (0x5), region = 69 }
  0xde   :  { %325 = vsyncpa [#allocation3], 1 }
  0xdf   :  { %327 = vsyncpa [#allocation3 + $0x1], 1 }

</bundles_post_ra>
